<compile_context>
chip_gen: v6e
topology: v6e:2x2x1
jax: 0.10.0
libtpu: 0.0.40
codegen_flags: <defaults>
</compile_context>

<pallas_src>
import jax
import jax.numpy as jnp
from jax import lax
from jax.experimental import pallas as pl
from jax.experimental.pallas import tpu as pltpu

_LANE = 128  # vreg lane width


def _round_up(n, m):
    return ((n + m - 1) // m) * m


def classifier_kernel(x_ref, w1t_ref, b1_ref, w2_ref, b2_ref, ot_ref):
    # x_ref:   (tm, H)  activation row tile (compute dtype)
    # w1t_ref: (H, H)   lin1 weight, pre-transposed to (in, out) layout
    # b1_ref:  (1, H)   lin1 bias (f32)
    # w2_ref:  (O, H)   lin2 weight, PyTorch (out, in) layout
    # b2_ref:  (O, 1)   lin2 bias as a column (f32)
    # ot_ref:  (O, tm)  transposed output tile (lane-dense along tm)
    x = x_ref[...]

    # lin1: h = x @ W1^T + b1  (canonical matmul; w1 was transposed once in
    # the wrapper).  f32 accumulation, bias+ReLU in f32 on the VPU.
    h = jnp.dot(x, w1t_ref[...], preferred_element_type=jnp.float32)
    h = jnp.maximum(h + b1_ref[...], 0.0)

    # lin2, emitted transposed: out^T[o, m] = sum_k W2[o, k] * h[m, k]
    # (contract the last dims of both operands -> trans-RHS MXU form, no
    # per-step weight transpose, lane-dense (O, tm) result).
    out_t = lax.dot_general(
        w2_ref[...], h.astype(w2_ref.dtype),
        (((1,), (1,)), ((), ())),
        preferred_element_type=jnp.float32,
    )
    out_t = out_t + b2_ref[...]
    ot_ref[...] = out_t.astype(ot_ref.dtype)


def classifier_forward(x, w1, b1, w2, b2, *, block_rows=1024,
                       compute_dtype=jnp.bfloat16):
    """Classifier head forward (matches the PyTorch module semantics).

    x:  (N, H)   activations
    w1: (H, H)   lin1 weight, PyTorch (out_features, in_features) layout
    b1: (H,)     lin1 bias
    w2: (O, H)   lin2 weight, PyTorch layout
    b2: (O,)     lin2 bias
    block_rows:  upper bound on the row-tile size (rounded to 128).
    compute_dtype: matmul operand dtype (default bf16); accumulation is f32.

    Returns (N, O) in x.dtype.
    """
    N, H = x.shape
    O, Hw = w2.shape
    assert Hw == H and w1.shape == (H, H) and b1.shape == (H,) and b2.shape == (O,)
    out_dtype = x.dtype

    # Row tile: must be a multiple of 128 lanes so the transposed (O, tm)
    # output block stays lane-dense / unmasked.  Aim for >= 2 grid steps
    # whenever N allows so v7x's two TensorCores both get work.
    if N <= _LANE:
        tm = _LANE
    else:
        tm = min(_round_up(block_rows, _LANE), _round_up(pl.cdiv(N, 2), _LANE))
    grid = (pl.cdiv(N, tm),)

    # One-time operand prep (all tiny except the x cast, which disappears if
    # the caller already supplies compute_dtype activations).
    xc = x.astype(compute_dtype)
    w1t = jnp.transpose(w1).astype(compute_dtype)      # (H_in, H_out)
    w2c = w2.astype(compute_dtype)                     # (O, H), PyTorch layout
    b1r = b1.reshape(1, H).astype(jnp.float32)
    b2c = b2.reshape(O, 1).astype(jnp.float32)

    c_it = jnp.dtype(compute_dtype).itemsize
    cost = pl.CostEstimate(
        flops=2 * N * H * (H + O),
        transcendentals=0,
        bytes_accessed=(N * H + H * H + O * H) * c_it
        + (H + O) * 4
        + O * N * jnp.dtype(out_dtype).itemsize,
    )

    out_t = pl.pallas_call(
        classifier_kernel,
        out_shape=jax.ShapeDtypeStruct((O, N), out_dtype),
        grid=grid,
        in_specs=[
            pl.BlockSpec((tm, H), lambda i: (i, 0)),   # x: row-tiled, full-width H
            pl.BlockSpec((H, H), lambda i: (0, 0)),    # w1^T: resident
            pl.BlockSpec((1, H), lambda i: (0, 0)),    # b1
            pl.BlockSpec((O, H), lambda i: (0, 0)),    # w2: resident
            pl.BlockSpec((O, 1), lambda i: (0, 0)),    # b2 column
        ],
        out_specs=pl.BlockSpec((O, tm), lambda i: (0, i)),
        compiler_params=pltpu.CompilerParams(
            dimension_semantics=("parallel",),
        ),
        cost_estimate=cost,
    )(xc, w1t, b1r, w2c, b2c)

    # Tiny (O, N) -> (N, O) layout fixup outside the kernel.
    return out_t.T


def _ref_forward(x, w1, b1, w2, b2):
    return jnp.maximum(x @ w1.T + b1, 0.0) @ w2.T + b2


if __name__ == "__main__":
    hidden_channels = 32
    out_channels = 8
    num_nodes = 16

    key = jax.random.PRNGKey(0)
    kx, k1, k2, k3, k4, kx2 = jax.random.split(key, 6)

    # Deterministic synthetic parameters (PyTorch Linear shapes).
    x = jax.random.normal(kx, (num_nodes, hidden_channels), jnp.float32)
    w1 = jax.random.normal(k1, (hidden_channels, hidden_channels), jnp.float32) * 0.1
    b1 = jax.random.normal(k2, (hidden_channels,), jnp.float32) * 0.1
    w2 = jax.random.normal(k3, (out_channels, hidden_channels), jnp.float32) * 0.1
    b2 = jax.random.normal(k4, (out_channels,), jnp.float32) * 0.1

    ref = _ref_forward(x, w1, b1, w2, b2)

    # f32 operand path: tight tolerance (single grid step, partial tile).
    out_f32 = classifier_forward(x, w1, b1, w2, b2, compute_dtype=jnp.float32)
    jax.block_until_ready(out_f32)
    assert out_f32.shape == (num_nodes, out_channels)
    assert jnp.allclose(out_f32, ref, atol=1e-4, rtol=1e-4)

    # Default bf16-operand path (f32 accumulation): looser tolerance.
    out_bf16 = classifier_forward(x, w1, b1, w2, b2)
    jax.block_until_ready(out_bf16)
    assert out_bf16.shape == (num_nodes, out_channels)
    assert jnp.allclose(out_bf16, ref, atol=2e-2, rtol=2e-2)

    # Larger ragged case exercising multiple grid steps + a partial edge tile.
    n_big = 600
    x_big = jax.random.normal(kx2, (n_big, hidden_channels), jnp.float32)
    ref_big = _ref_forward(x_big, w1, b1, w2, b2)
    out_big = classifier_forward(x_big, w1, b1, w2, b2, block_rows=256)
    jax.block_until_ready(out_big)
    assert out_big.shape == (n_big, out_channels)
    assert jnp.allclose(out_big, ref_big, atol=2e-2, rtol=2e-2)

    print("KERNEL_OK")
</pallas_src>

<mosaic_0001>
module attributes {stable_mosaic.version = 11 : i64} {
  func.func @classifier_kernel(%arg0: i32, %arg1: memref<128x32xf32, #tpu.memory_space<vmem>>, %arg2: memref<32x32xf32, #tpu.memory_space<vmem>>, %arg3: memref<1x32xf32, #tpu.memory_space<vmem>>, %arg4: memref<8x32xf32, #tpu.memory_space<vmem>>, %arg5: memref<8x1xf32, #tpu.memory_space<vmem>>, %arg6: memref<8x128xf32, #tpu.memory_space<vmem>>) attributes {dimension_semantics = [#tpu.dimension_semantics<parallel>], iteration_bounds = array<i64: 1>, scalar_prefetch = 0 : i64, scratch_operands = 0 : i64, tpu.core_type = #tpu.core_type<tc>, window_params = [{transform_indices = @transform_0, window_bounds = array<i64: 128, 32>}, {pipeline_mode = #tpu.pipeline_mode<synchronous>, transform_indices = @transform_1, window_bounds = array<i64: 32, 32>}, {pipeline_mode = #tpu.pipeline_mode<synchronous>, transform_indices = @transform_2, window_bounds = array<i64: 1, 32>}, {pipeline_mode = #tpu.pipeline_mode<synchronous>, transform_indices = @transform_3, window_bounds = array<i64: 8, 32>}, {pipeline_mode = #tpu.pipeline_mode<synchronous>, transform_indices = @transform_4, window_bounds = array<i64: 8, 1>}, {transform_indices = @transform_5, window_bounds = array<i64: 8, 128>}]} {
    %c0 = arith.constant 0 : index
    %c0_0 = arith.constant 0 : index
    %0 = vector.load %arg1[%c0, %c0_0] : memref<128x32xf32, #tpu.memory_space<vmem>>, vector<128x32xf32>
    %c0_1 = arith.constant 0 : index
    %c0_2 = arith.constant 0 : index
    %1 = vector.load %arg2[%c0_1, %c0_2] : memref<32x32xf32, #tpu.memory_space<vmem>>, vector<32x32xf32>
    %cst = arith.constant dense<0.000000e+00> : vector<128x32xf32>
    %2 = tpu.matmul %0, %1, %cst {dimension_numbers = #tpu.dot_dimension_numbers<[1], [0], [0], [1], [0, 0, 1, 1], [], []>} : vector<128x32xf32>, vector<32x32xf32>, vector<128x32xf32> -> vector<128x32xf32>
    %c0_3 = arith.constant 0 : index
    %c0_4 = arith.constant 0 : index
    %3 = vector.load %arg3[%c0_3, %c0_4] : memref<1x32xf32, #tpu.memory_space<vmem>>, vector<1x32xf32>
    %4 = vector.broadcast %3 : vector<1x32xf32> to vector<128x32xf32>
    %5 = arith.addf %2, %4 : vector<128x32xf32>
    %cst_5 = arith.constant 0.000000e+00 : f32
    %6 = vector.broadcast %cst_5 : f32 to vector<128x32xf32>
    %7 = arith.maximumf %5, %6 : vector<128x32xf32>
    %c0_6 = arith.constant 0 : index
    %c0_7 = arith.constant 0 : index
    %8 = vector.load %arg4[%c0_6, %c0_7] : memref<8x32xf32, #tpu.memory_space<vmem>>, vector<8x32xf32>
    %cst_8 = arith.constant dense<0.000000e+00> : vector<8x128xf32>
    %9 = tpu.matmul %8, %7, %cst_8 {dimension_numbers = #tpu.dot_dimension_numbers<[1], [1], [0], [0], [0, 0, 1, 0], [], []>} : vector<8x32xf32>, vector<128x32xf32>, vector<8x128xf32> -> vector<8x128xf32>
    %c0_9 = arith.constant 0 : index
    %c0_10 = arith.constant 0 : index
    %10 = vector.load %arg5[%c0_9, %c0_10] : memref<8x1xf32, #tpu.memory_space<vmem>>, vector<8x1xf32>
    %11 = vector.broadcast %10 : vector<8x1xf32> to vector<8x128xf32>
    %12 = arith.addf %9, %11 : vector<8x128xf32>
    %c0_11 = arith.constant 0 : index
    %c0_12 = arith.constant 0 : index
    %13 = vector.load %arg6[%c0_11, %c0_12] : memref<8x128xf32, #tpu.memory_space<vmem>>, vector<8x128xf32>
    tpu.vector_store %arg6[%c0_11, %c0_12], %12 {strides = array<i32>} : memref<8x128xf32, #tpu.memory_space<vmem>>, vector<8x128xf32>,
    return
  }
  func.func @transform_0(%arg0: i32) -> (i32, i32) {
    %c0_i32 = arith.constant 0 : i32
    %c0_i32_0 = arith.constant 0 : i32
    return %arg0, %c0_i32 : i32, i32
  }
  func.func @transform_1(%arg0: i32) -> (i32, i32) {
    %c0_i32 = arith.constant 0 : i32
    %c0_i32_0 = arith.constant 0 : i32
    %c0_i32_1 = arith.constant 0 : i32
    return %c0_i32, %c0_i32_0 : i32, i32
  }
  func.func @transform_2(%arg0: i32) -> (i32, i32) {
    %c0_i32 = arith.constant 0 : i32
    %c0_i32_0 = arith.constant 0 : i32
    %c0_i32_1 = arith.constant 0 : i32
    return %c0_i32, %c0_i32_0 : i32, i32
  }
  func.func @transform_3(%arg0: i32) -> (i32, i32) {
    %c0_i32 = arith.constant 0 : i32
    %c0_i32_0 = arith.constant 0 : i32
    %c0_i32_1 = arith.constant 0 : i32
    return %c0_i32, %c0_i32_0 : i32, i32
  }
  func.func @transform_4(%arg0: i32) -> (i32, i32) {
    %c0_i32 = arith.constant 0 : i32
    %c0_i32_0 = arith.constant 0 : i32
    %c0_i32_1 = arith.constant 0 : i32
    return %c0_i32, %c0_i32_0 : i32, i32
  }
  func.func @transform_5(%arg0: i32) -> (i32, i32) {
    %c0_i32 = arith.constant 0 : i32
    %c0_i32_0 = arith.constant 0 : i32
    return %c0_i32, %arg0 : i32, i32
  }
}

</mosaic_0001>

<bundles_post_ra>
// kernel: tpu_custom_call.1
= control target key start
LH: loop header
LB: loop body
LE: loop exit
PB: predicated region body
PF: predicated region fallthrough
CT: control target
= control target key end

     0   :  { %10 = vsyncpa [#allocation3], 0  ;;  %s759_s0 = inlined_call_operand.hbm [shape: f32[16,32], index: 0, kind: input, shape index: {}]   ;;  %s760_s1 = inlined_call_operand.hbm [shape: f32[32,32], index: 1, kind: input, shape index: {}]   ;;  %s761_s2 = inlined_call_operand.vmem [shape: f32[1,32], index: 2, kind: input, shape index: {}]   ;;  %s762_s3 = inlined_call_operand.vmem [shape: f32[8,32], index: 3, kind: input, shape index: {}]   ;;  %s763_s4 = inlined_call_operand.vmem [shape: f32[8,1], index: 4, kind: input, shape index: {}]   ;;  %s764_s5 = inlined_call_operand.hbm [shape: f32[8,16], index: 5, kind: output, shape index: {}]  }
   0x1   :  { %11 = vsyncpa [#allocation6], 0 }
   0x2   :  { %12 = vsyncpa [#allocation4], 0 }
   0x3   :  { %17 = vsyncadd [#allocation3], 1792  ;;  %s644_s18 = smov [#allocation2]  }
   0x4   :  { %s18_s19 = sshll.u32 %s644_s18, 4  ;;  %s19_s19 = int_to_ptr.vmem [resolvable:$true] %s18_s19 }
   0x5   :  { %s586_s20 = scalar_lea.vmem %s19_s19, 256  ;;  %s590_s21 = scalar_lea.vmem %s19_s19, 2048 }
   0x6   :  { %p587_p0 = scmp.ne.s32.totalorder %s19_s19, %s586_s20  ;;  %p591_p1 = scmp.lt.s32.totalorder %s19_s19, %s19_s19 }
   0x7   :  { %p592_p2 = scmp.lt.s32.totalorder %s590_s21, %s586_s20 }
   0x9   :  { %p593_p3 = por %p592_p2, %p591_p1 }
   0xb   :  { %p594_p4 = pnand %p593_p3, %p587_p0 }
   0xd   :  { %597 = shalt.err (!%p594_p4)
}
   0xe   :  { %s645_s22 = smov 128   ;;  %s646_s23 = smov 8  }
   0xf   :  { %24 = dma.hbm_to_vmem [thread:$0]  %s759_s0, 256, %s19_s19, [#allocation3], %s645_s22, %s645_s22, %s646_s23  }
  0x10   :  { %s647_s26 = smov [#allocation5]  }
  0x11   :  { %s30_s27 = sshll.u32 %s647_s26, 4  ;;  %s31_s27 = int_to_ptr.vmem [resolvable:$true] %s30_s27 }
  0x12   :  { %s606_s28 = scalar_lea.vmem %s31_s27, 512  ;;  %p611_p6 = scmp.lt.s32.totalorder %s31_s27, %s31_s27 }
  0x13   :  { %p607_p5 = scmp.ne.s32.totalorder %s31_s27, %s606_s28  ;;  %p612_p7 = scmp.lt.s32.totalorder %s606_s28, %s606_s28 }
  0x15   :  { %p613_p8 = por %p612_p7, %p611_p6 }
  0x17   :  { %p614_p9 = pnand %p613_p8, %p607_p5 }
  0x19   :  { %617 = shalt.err (!%p614_p9)
}
  0x1a   :  { %36 = dma.hbm_to_vmem [thread:$0]  %s760_s1, 512, %s31_s27, [#allocation6], %s645_s22, %s645_s22, %s646_s23  }
  0x1b   :  { %638 = dma.done.wait [#allocation3], 2048  }
  0x1c   :  { %639 = vsyncadd [#allocation3], 4294965248 }
  0x1d   :  { %640 = dma.done.wait [#allocation6], 512  }
  0x1e   :  { %641 = vsyncadd [#allocation6], 4294966784  ;;  %vm76_vm0 = vcmask 261120   ;;  %v68_v0 = vld [vmem:[#allocation5 + $0x18] sm:$0xff]  ;;  %v67_v1 = vld [vmem:[#allocation5 + $0x10] sm:$0xff]  ;;  %v648_v20 = vmov 0.0  }
  0x1f   :  { %502 = vmatprep.subr.mxu0 %v68_v0  ;;  %v49_v2 = vld [vmem:[#allocation2] sm:$0xff]  ;;  %v66_v3 = vld [vmem:[#allocation5 + $0x8] sm:$0xff]  ;;  %v51_v6 = vld [vmem:[#allocation2 + $0x10] sm:$0xff]  ;;  %534 = vmatprep.subr.mxu1 %v648_v20  ;;  %vm649_vm1 = vmmov 0   ;;  %v650_v22 = vmov 0   ;;  %s651_s8 = smov [#allocation7]  }
  0x20   :  { %503 = vmatpush3.msra.mxu0 %v68_v0  ;;  %510 = vmatprep.mubr.msk.f32.mxu0 %vm76_vm0, %v49_v2  ;;  %v65_v4 = vld [vmem:[#allocation5] sm:$0xff]  ;;  %v50_v5 = vld [vmem:[#allocation2 + $0x8] sm:$0xff]  ;;  %v52_v7 = vld [vmem:[#allocation2 + $0x18] sm:$0xff]  ;;  %s421_s9 = sshll.u32 %s651_s8, 4  ;;  %s422_s9 = int_to_ptr.vmem [resolvable:$true] %s421_s9 }
  0x21   :  { %504 = vmatprep.subr.mxu0 %v67_v1  ;;  %v53_v8 = vld [vmem:[#allocation2 + $0x20] sm:$0xff]  ;;  %v54_v9 = vld [vmem:[#allocation2 + $0x28] sm:$0xff]  ;;  %v55_v10 = vld [vmem:[#allocation2 + $0x30] sm:$0xff]  ;;  %566 = vmatprep.mubr.msk.f32.mxu1 %vm649_vm1, %v648_v20  ;;  %s618_s10 = scalar_lea.vmem %s422_s9, 128  ;;  %p623_p11 = scmp.lt.s32.totalorder %s422_s9, %s422_s9 }
  0x22   :  { %505 = vmatpush3.msra.mxu0 %v67_v1  ;;  %v56_v11 = vld [vmem:[#allocation2 + $0x38] sm:$0xff]  ;;  %v57_v12 = vld [vmem:[#allocation2 + $0x40] sm:$0xff]  ;;  %v58_v13 = vld [vmem:[#allocation2 + $0x48] sm:$0xff]  ;;  %577 = vset.pattern.permute.xlu0 %v650_v22  ;;  %p619_p10 = scmp.ne.s32.totalorder %s422_s9, %s618_s10  ;;  %p624_p12 = scmp.lt.s32.totalorder %s618_s10, %s618_s10 }
  0x23   :  { %506 = vmatprep.subr.mxu0 %v66_v3  ;;  %v59_v14 = vld [vmem:[#allocation2 + $0x50] sm:$0xff]  ;;  %v60_v15 = vld [vmem:[#allocation2 + $0x58] sm:$0xff]  ;;  %v61_v16 = vld [vmem:[#allocation2 + $0x60] sm:$0xff] }
  0x24   :  { %507 = vmatpush3.msra.mxu0 %v66_v3  ;;  %v62_v17 = vld [vmem:[#allocation2 + $0x68] sm:$0xff]  ;;  %v63_v18 = vld [vmem:[#allocation2 + $0x70] sm:$0xff]  ;;  %v64_v19 = vld [vmem:[#allocation2 + $0x78] sm:$0xff]  ;;  %p625_p13 = por %p624_p12, %p623_p11 }
  0x25   :  { %508 = vmatprep.subr.mxu0 %v65_v4  ;;  %v287_v21 = vld [vmem:[%s763_s4] sm:$0xff] }
  0x26   :  { %509 = vmatpush3.msra.mxu0 %v65_v4  ;;  %290 = vperm.xlu0 %577, %v287_v21   ;;  %v431_v37 = vld [vmem:[%s761_s2] ss:$0 sm:$0xff]  ;;  %p626_p0 = pnand %p625_p13, %p619_p10 }
  0x27   :  { %511 = vmatmul.mubr.msk.f32.vlgmr.msra.gmra.mxu0 %vm76_vm0, %v50_v5 }
  0x28   :  { %513 = vmatprep.mubr.msk.f32.mxu0 %vm76_vm0, %v51_v6 }
  0x2b   :  { %514 = vmatmul.mubr.msk.f32.gmra.mxu0 %vm76_vm0, %v52_v7 }
  0x2c   :  { %516 = vmatprep.mubr.msk.f32.mxu0 %vm76_vm0, %v53_v8  ;;  %v286_v8 = vld [vmem:[%s762_s3] sm:$0xff] }
  0x2f   :  { %517 = vmatmul.mubr.msk.f32.gmra.mxu0 %vm76_vm0, %v54_v9 }
  0x30   :  { %519 = vmatprep.mubr.msk.f32.mxu0 %vm76_vm0, %v55_v10 }
  0x33   :  { %520 = vmatmul.mubr.msk.f32.gmra.mxu0 %vm76_vm0, %v56_v11 }
  0x34   :  { %522 = vmatprep.mubr.msk.f32.mxu0 %vm76_vm0, %v57_v12 }
  0x37   :  { %523 = vmatmul.mubr.msk.f32.gmra.mxu0 %vm76_vm0, %v58_v13 }
  0x38   :  { %525 = vmatprep.mubr.msk.f32.mxu0 %vm76_vm0, %v59_v14 }
  0x3b   :  { %526 = vmatmul.mubr.msk.f32.gmra.mxu0 %vm76_vm0, %v60_v15 }
  0x3c   :  { %528 = vmatprep.mubr.msk.f32.mxu0 %vm76_vm0, %v61_v16 }
  0x3f   :  { %529 = vmatmul.mubr.msk.f32.gmra.mxu0 %vm76_vm0, %v62_v17 }
  0x40   :  { %531 = vmatprep.mubr.msk.f32.mxu0 %vm76_vm0, %v63_v18 }
  0x43   :  { %532 = vmatmul.mubr.msk.f32.gmra.mxu0 %vm76_vm0, %v64_v19 }
  0xa1   :  { %v291_v9 = vpop.permute.xlu0 %290 }
  0xe7   :  { %v709_v23 = vpop.f32.mrf.mxu0 }
  0xe8   :  { %v197_v3 = vadd.f32 %v709_v23, %v431_v37 }
  0xe9   :  { %v711_v24 = vpop.f32.mrf.mxu0 }
  0xea   :  { %v271_v5 = vmax.f32 %v197_v3, 0.0  ;;  %v192_v6 = vadd.f32 %v431_v37, %v711_v24 }
  0xeb   :  { %v515_v25 = vpop.f32.mrf.mxu0 }
  0xec   :  { %v207_v63 = vadd.f32 %v515_v25, %v431_v37  ;;  %v270_v7 = vmax.f32 %v192_v6, 0.0 }
  0xed   :  { %v713_v26 = vpop.f32.mrf.mxu0 }
  0xee   :  { %v273_v1 = vmax.f32 %v207_v63, 0.0  ;;  %v202_v2 = vadd.f32 %v431_v37, %v713_v26 }
  0xef   :  { %v518_v27 = vpop.f32.mrf.mxu0 }
  0xf0   :  { %v217_v59 = vadd.f32 %v518_v27, %v431_v37  ;;  %v272_v4 = vmax.f32 %v202_v2, 0.0 }
  0xf1   :  { %v211_v28 = vpop.f32.mrf.mxu0 }
  0xf2   :  { %v275_v61 = vmax.f32 %v217_v59, 0.0  ;;  %v212_v62 = vadd.f32 %v431_v37, %v211_v28 }
  0xf3   :  { %v521_v29 = vpop.f32.mrf.mxu0 }
  0xf4   :  { %v227_v55 = vadd.f32 %v521_v29, %v431_v37  ;;  %v274_v0 = vmax.f32 %v212_v62, 0.0 }
  0xf5   :  { %v221_v30 = vpop.f32.mrf.mxu0 }
  0xf6   :  { %v277_v57 = vmax.f32 %v227_v55, 0.0  ;;  %v222_v58 = vadd.f32 %v431_v37, %v221_v30 }
  0xf7   :  { %v524_v31 = vpop.f32.mrf.mxu0 }
  0xf8   :  { %v237_v51 = vadd.f32 %v524_v31, %v431_v37  ;;  %v276_v60 = vmax.f32 %v222_v58, 0.0 }
  0xf9   :  { %v231_v32 = vpop.f32.mrf.mxu0 }
  0xfa   :  { %v279_v53 = vmax.f32 %v237_v51, 0.0  ;;  %v232_v54 = vadd.f32 %v431_v37, %v231_v32 }
  0xfb   :  { %v527_v33 = vpop.f32.mrf.mxu0 }
  0xfc   :  { %v247_v47 = vadd.f32 %v527_v33, %v431_v37  ;;  %v278_v56 = vmax.f32 %v232_v54, 0.0 }
  0xfd   :  { %v241_v34 = vpop.f32.mrf.mxu0 }
  0xfe   :  { %v281_v49 = vmax.f32 %v247_v47, 0.0  ;;  %v242_v50 = vadd.f32 %v431_v37, %v241_v34 }
  0xff   :  { %v530_v35 = vpop.f32.mrf.mxu0 }
 0x100   :  { %v257_v43 = vadd.f32 %v530_v35, %v431_v37  ;;  %v280_v52 = vmax.f32 %v242_v50, 0.0 }
 0x101   :  { %v251_v36 = vpop.f32.mrf.mxu0 }
 0x102   :  { %v283_v45 = vmax.f32 %v257_v43, 0.0  ;;  %v252_v46 = vadd.f32 %v431_v37, %v251_v36 }
 0x103   :  { %v533_v38 = vpop.f32.mrf.mxu0 }
 0x104   :  { %v267_v39 = vadd.f32 %v533_v38, %v431_v37  ;;  %v282_v48 = vmax.f32 %v252_v46, 0.0 }
 0x105   :  { %v261_v40 = vpop.f32.mrf.mxu0 }
 0x106   :  { %v285_v41 = vmax.f32 %v267_v39, 0.0  ;;  %v262_v42 = vadd.f32 %v431_v37, %v261_v40 }
 0x108   :  { %535 = vmatpush3.xpose.msk.msra.mxu1 %vm76_vm0, %v285_v41  ;;  %v284_v44 = vmax.f32 %v262_v42, 0.0 }
 0x109   :  { %536 = vmatprep.subr.mxu1 %v648_v20 }
 0x10c   :  { %537 = vmatpush3.xpose.msk.msra.mxu1 %vm76_vm0, %v284_v44 }
 0x10d   :  { %538 = vmatprep.subr.mxu1 %v648_v20 }
 0x110   :  { %539 = vmatpush3.xpose.msk.msra.mxu1 %vm76_vm0, %v283_v45 }
 0x111   :  { %540 = vmatprep.subr.mxu1 %v648_v20 }
 0x114   :  { %541 = vmatpush3.xpose.msk.msra.mxu1 %vm76_vm0, %v282_v48 }
 0x115   :  { %542 = vmatprep.subr.mxu1 %v648_v20 }
 0x118   :  { %543 = vmatpush3.xpose.msk.msra.mxu1 %vm76_vm0, %v281_v49 }
 0x119   :  { %544 = vmatprep.subr.mxu1 %v648_v20 }
 0x11c   :  { %545 = vmatpush3.xpose.msk.msra.mxu1 %vm76_vm0, %v280_v52 }
 0x11d   :  { %546 = vmatprep.subr.mxu1 %v648_v20 }
 0x120   :  { %547 = vmatpush3.xpose.msk.msra.mxu1 %vm76_vm0, %v279_v53 }
 0x121   :  { %548 = vmatprep.subr.mxu1 %v648_v20 }
 0x124   :  { %549 = vmatpush3.xpose.msk.msra.mxu1 %vm76_vm0, %v278_v56 }
 0x125   :  { %550 = vmatprep.subr.mxu1 %v648_v20 }
 0x128   :  { %551 = vmatpush3.xpose.msk.msra.mxu1 %vm76_vm0, %v277_v57 }
 0x129   :  { %552 = vmatprep.subr.mxu1 %v648_v20 }
 0x12c   :  { %553 = vmatpush3.xpose.msk.msra.mxu1 %vm76_vm0, %v276_v60 }
 0x12d   :  { %554 = vmatprep.subr.mxu1 %v648_v20 }
 0x130   :  { %555 = vmatpush3.xpose.msk.msra.mxu1 %vm76_vm0, %v275_v61 }
 0x131   :  { %556 = vmatprep.subr.mxu1 %v648_v20 }
 0x134   :  { %557 = vmatpush3.xpose.msk.msra.mxu1 %vm76_vm0, %v274_v0 }
 0x135   :  { %558 = vmatprep.subr.mxu1 %v648_v20 }
 0x138   :  { %559 = vmatpush3.xpose.msk.msra.mxu1 %vm76_vm0, %v273_v1 }
 0x139   :  { %560 = vmatprep.subr.mxu1 %v648_v20 }
 0x13c   :  { %561 = vmatpush3.xpose.msk.msra.mxu1 %vm76_vm0, %v272_v4 }
 0x13d   :  { %562 = vmatprep.subr.mxu1 %v648_v20 }
 0x140   :  { %563 = vmatpush3.xpose.msk.msra.mxu1 %vm76_vm0, %v271_v5 }
 0x141   :  { %564 = vmatprep.subr.mxu1 %v648_v20 }
 0x144   :  { %565 = vmatpush3.xpose.msk.msra.mxu1 %vm76_vm0, %v270_v7 }
 0x147   :  { %567 = vmatmul.mubr.msk.f32.vlgmr.msra.gmra.mxu1 %vm76_vm0, %v286_v8 }
 0x207   :  { %v410_v10 = vpop.f32.mrf.mxu1 }
 0x208   :  { %v411_v11 = vadd.f32 %v410_v10, %v291_v9 }
 0x209   :  { %v568_v12 = vpop.f32.mrf.mxu1 }
 0x20a   :  { %414 = vst [vmem:[#allocation7] sm:$0xff] %v411_v11 }
 0x20b   :  { %629 = shalt.err (!%p626_p0)
}
 0x20c   :  { %424 = dma.vmem_to_hbm [thread:$0]  %s422_s9, 128, %s764_s5, [#allocation4]  }
 0x20d   :  { %642 = dma.done.wait [#allocation4], 128  }
 0x20e   :  { %643 = vsyncadd [#allocation4], 4294967168 }
 0x20f   :  { %428 = vsyncpa [#allocation3], 1 }
 0x210   :  { %429 = vsyncpa [#allocation6], 1 }
 0x211   :  { %430 = vsyncpa [#allocation4], 1 }

</bundles_post_ra>
